<compile_context>
chip_gen: v6e
topology: v6e:2x2x1
jax: 0.10.0
libtpu: 0.0.40
codegen_flags: <defaults>
</compile_context>

<pallas_src>
import math

import jax
import jax.numpy as jnp
from jax.experimental import pallas as pl
from jax.experimental.pallas import tpu as pltpu


def _round_up(x, m):
    return (x + m - 1) // m * m


def _pick_tile(n, cap, unit, min_good):
    """Tile size: multiple of `unit`, <= cap.

    Prefers the largest such tile that divides round_up(n, unit) so the big
    operand needs no padding copy; falls back to `cap` (padding) only when the
    best divisor would make per-step DMAs tiny.
    """
    n_r = _round_up(n, unit)
    cap = min(cap, n_r)
    best = unit
    for t in range(unit, cap + 1, unit):
        if n_r % t == 0:
            best = t
    if best < min_good and cap > best:
        return cap
    return best


# ---------------------------------------------------------------------------
# Kernel 1: support = X @ W   (tiny; O(N * d_pad) traffic, f32 throughout)
# ---------------------------------------------------------------------------
def _support_kernel(x_ref, w_ref, s_ref):
    s_ref[...] = jnp.dot(
        x_ref[...], w_ref[...], preferred_element_type=jnp.float32
    )


# ---------------------------------------------------------------------------
# Kernel 2: output = A @ support, K-tiled reduction with a VMEM accumulator
# ---------------------------------------------------------------------------
def _aggregate_kernel(a_ref, s_ref, o_ref, acc_ref):
    k = pl.program_id(1)

    @pl.when(k == 0)
    def _():
        acc_ref[...] = jnp.zeros_like(acc_ref)

    acc_ref[...] += jnp.dot(
        a_ref[...], s_ref[...], preferred_element_type=jnp.float32
    )

    @pl.when(k == pl.num_programs(1) - 1)
    def _():
        o_ref[...] = acc_ref[...]


def gcn_forward(x, weight, adj, *, tile_rows=256, tile_k=2048):
    """Pallas GCN forward: adj @ (x @ weight), all-f32 (matches torch semantics)."""
    N, d_in = x.shape
    d_out = weight.shape[1]
    assert adj.shape == (N, N)

    # ---- tile selection ----------------------------------------------------
    # Lane-dense feature dim (multiple of 128 -> unmasked vst, full MXU lanes).
    d_pad = _round_up(max(d_out, 1), 128)

    # Row tile (multiple of 8).  If the whole graph fits in one tile, split it
    # in two so the parallel grid axis has >= 2 steps (v7x megacore).
    tr = _pick_tile(N, tile_rows, 8, min_good=64)
    if _round_up(N, tr) == tr and tr >= 16 and (tr // 2) % 8 == 0:
        tr //= 2

    # K (reduction) tile: multiple of 128, bounds VMEM independent of N.
    tk = _pick_tile(N, tile_k, 128, min_good=512)

    n_rows = _round_up(N, tr)   # padded row count of adj / output
    n_cols = _round_up(N, tk)   # padded col count of adj == rows of x / support

    # ---- padding: only materialized when the shapes don't already divide ---
    # Zero row/column padding is mathematically inert.  The adjacency stays
    # f32 and is NOT copied/cast in the common case: it is the dominant HBM
    # stream and is consumed exactly once per call.
    x_p = x if N == n_cols else jnp.zeros((n_cols, d_in), x.dtype).at[:N].set(x)
    w_p = (
        weight
        if d_pad == d_out
        else jnp.zeros((d_in, d_pad), weight.dtype).at[:, :d_out].set(weight)
    )
    a_p = (
        adj
        if (N == n_rows and N == n_cols)
        else jnp.zeros((n_rows, n_cols), adj.dtype).at[:N, :N].set(adj)
    )

    # ---- kernel 1: support = X @ W ------------------------------------------
    support = pl.pallas_call(
        _support_kernel,
        out_shape=jax.ShapeDtypeStruct((n_cols, d_pad), jnp.float32),
        grid_spec=pltpu.PrefetchScalarGridSpec(
            num_scalar_prefetch=0,
            grid=(n_cols // tk,),
            in_specs=[
                pl.BlockSpec((tk, d_in), lambda i: (i, 0)),
                pl.BlockSpec((d_in, d_pad), lambda i: (0, 0)),
            ],
            out_specs=pl.BlockSpec((tk, d_pad), lambda i: (i, 0)),
        ),
        compiler_params=pltpu.CompilerParams(
            dimension_semantics=("parallel",),
        ),
    )(x_p, w_p)

    # ---- kernel 2: output = A @ support --------------------------------------
    # grid = (row tiles [parallel], K tiles [arbitrary, innermost reduction]).
    itemsize = 4
    vmem_need = (
        2 * tr * tk * itemsize        # double-buffered adjacency blocks
        + 2 * tk * d_pad * itemsize   # double-buffered support blocks
        + 2 * tr * d_pad * itemsize   # double-buffered output blocks
        + tr * d_pad * itemsize       # f32 accumulator scratch
    )
    vmem_limit = min(max(2 * vmem_need, 32 << 20), 64 << 20)

    out_p = pl.pallas_call(
        _aggregate_kernel,
        out_shape=jax.ShapeDtypeStruct((n_rows, d_pad), jnp.float32),
        grid_spec=pltpu.PrefetchScalarGridSpec(
            num_scalar_prefetch=0,
            grid=(n_rows // tr, n_cols // tk),
            in_specs=[
                pl.BlockSpec((tr, tk), lambda i, k: (i, k)),
                pl.BlockSpec((tk, d_pad), lambda i, k: (k, 0)),
            ],
            out_specs=pl.BlockSpec((tr, d_pad), lambda i, k: (i, 0)),
            scratch_shapes=[pltpu.VMEM((tr, d_pad), jnp.float32)],
        ),
        compiler_params=pltpu.CompilerParams(
            dimension_semantics=("parallel", "arbitrary"),
            vmem_limit_bytes=vmem_limit,
        ),
    )(a_p, support)

    if n_rows == N and d_pad == d_out:
        return out_p
    return out_p[:N, :d_out]


def xavier_uniform(key, shape, gain):
    """torch.nn.init.xavier_uniform_ equivalent for a 2-D weight."""
    fan_in, fan_out = shape
    bound = gain * math.sqrt(6.0 / (fan_in + fan_out))
    return jax.random.uniform(
        key, shape, dtype=jnp.float32, minval=-bound, maxval=bound
    )


if __name__ == "__main__":
    # Small shapes consistent with the module:
    #   N nodes, input_dim features in, output_dim features out, layout_dim=3.
    N, input_dim, output_dim, layout_dim = 256, 32, 16, 3

    key = jax.random.PRNGKey(0)
    k_x, k_w, k_a = jax.random.split(key, 3)

    # Node features.
    x = jax.random.normal(k_x, (N, input_dim), dtype=jnp.float32)

    # Deterministic xavier-uniform weight with gain = N ** (1/layout_dim).
    gain = N ** (1.0 / layout_dim)
    weight = xavier_uniform(k_w, (input_dim, output_dim), gain)

    # Deterministic dense adjacency: symmetric random graph + self-loops,
    # row-normalized (torch.spmm with a dense matrix is just a matmul).
    raw = jax.random.uniform(k_a, (N, N)) < 0.1
    adj = (raw | raw.T | jnp.eye(N, dtype=bool)).astype(jnp.float32)
    adj = adj / jnp.sum(adj, axis=1, keepdims=True)

    out = gcn_forward(x, weight, adj)   # grid: rows=(2,), K=1 at this size
    out = jax.block_until_ready(out)
    assert out.shape == (N, output_dim)

    # Full-precision f32 reference (module semantics).
    support_ref = jnp.dot(x, weight, precision=jax.lax.Precision.HIGHEST)
    ref = jnp.dot(adj, support_ref, precision=jax.lax.Precision.HIGHEST)
    assert jnp.allclose(out, ref, atol=2e-2, rtol=1e-2), float(
        jnp.max(jnp.abs(out - ref))
    )

    print("KERNEL_OK")
</pallas_src>

<mosaic_0001>
module attributes {stable_mosaic.version = 11 : i64} {
  func.func @_support_kernel(%arg0: i32, %arg1: memref<256x32xf32, #tpu.memory_space<vmem>>, %arg2: memref<32x128xf32, #tpu.memory_space<vmem>>, %arg3: memref<256x128xf32, #tpu.memory_space<vmem>>) attributes {dimension_semantics = [#tpu.dimension_semantics<parallel>], iteration_bounds = array<i64: 1>, scalar_prefetch = 0 : i64, scratch_operands = 0 : i64, tpu.core_type = #tpu.core_type<tc>, window_params = [{transform_indices = @transform_0, window_bounds = array<i64: 256, 32>}, {pipeline_mode = #tpu.pipeline_mode<synchronous>, transform_indices = @transform_1, window_bounds = array<i64: 32, 128>}, {transform_indices = @transform_2, window_bounds = array<i64: 256, 128>}]} {
    %c0 = arith.constant 0 : index
    %c0_0 = arith.constant 0 : index
    %0 = vector.load %arg1[%c0, %c0_0] : memref<256x32xf32, #tpu.memory_space<vmem>>, vector<256x32xf32>
    %c0_1 = arith.constant 0 : index
    %c0_2 = arith.constant 0 : index
    %1 = vector.load %arg2[%c0_1, %c0_2] : memref<32x128xf32, #tpu.memory_space<vmem>>, vector<32x128xf32>
    %cst = arith.constant dense<0.000000e+00> : vector<256x128xf32>
    %2 = tpu.matmul %0, %1, %cst {dimension_numbers = #tpu.dot_dimension_numbers<[1], [0], [0], [1], [0, 0, 1, 1], [], []>} : vector<256x32xf32>, vector<32x128xf32>, vector<256x128xf32> -> vector<256x128xf32>
    %c0_3 = arith.constant 0 : index
    %c0_4 = arith.constant 0 : index
    %3 = vector.load %arg3[%c0_3, %c0_4] : memref<256x128xf32, #tpu.memory_space<vmem>>, vector<256x128xf32>
    tpu.vector_store %arg3[%c0_3, %c0_4], %2 {strides = array<i32>} : memref<256x128xf32, #tpu.memory_space<vmem>>, vector<256x128xf32>,
    return
  }
  func.func @transform_0(%arg0: i32) -> (i32, i32) {
    %c0_i32 = arith.constant 0 : i32
    %c0_i32_0 = arith.constant 0 : i32
    return %arg0, %c0_i32 : i32, i32
  }
  func.func @transform_1(%arg0: i32) -> (i32, i32) {
    %c0_i32 = arith.constant 0 : i32
    %c0_i32_0 = arith.constant 0 : i32
    %c0_i32_1 = arith.constant 0 : i32
    return %c0_i32, %c0_i32_0 : i32, i32
  }
  func.func @transform_2(%arg0: i32) -> (i32, i32) {
    %c0_i32 = arith.constant 0 : i32
    %c0_i32_0 = arith.constant 0 : i32
    return %arg0, %c0_i32 : i32, i32
  }
}

</mosaic_0001>

<bundles_post_ra>
// kernel: tpu_custom_call.1
= control target key start
LH: loop header
LB: loop body
LE: loop exit
PB: predicated region body
PF: predicated region fallthrough
CT: control target
= control target key end

     0   :  { %vm48_vm0 = vcmask 261120   ;;  %s736_s0 = inlined_call_operand.vmem [shape: f32[256,32], index: 0, kind: input, shape index: {}]   ;;  %s737_s1 = inlined_call_operand.vmem [shape: f32[32,128], index: 1, kind: input, shape index: {}]   ;;  %s738_s2 = inlined_call_operand.hbm [shape: f32[256,128], index: 2, kind: output, shape index: {}]  }
   0x1   :  { %v47_v0 = vld [vmem:[%s737_s1 + $0x18] sm:$0xff]  ;;  %v46_v1 = vld [vmem:[%s737_s1 + $0x10] sm:$0xff]  ;;  %v45_v2 = vld [vmem:[%s737_s1 + $0x8] sm:$0xff] }
   0x2   :  { %486 = vmatprep.subr.mxu0 %v47_v0  ;;  %542 = vmatprep.subr.mxu1 %v47_v0  ;;  %v44_v3 = vld [vmem:[%s737_s1] sm:$0xff]  ;;  %v13_v6 = vld [vmem:[%s736_s0 + $0x8] sm:$0xff]  ;;  %v14_v8 = vld [vmem:[%s736_s0 + $0x10] sm:$0xff] }
   0x3   :  { %487 = vmatpush3.msra.mxu0 %v47_v0  ;;  %546 = vmatpush3.msra.mxu1 %v47_v0  ;;  %v12_v4 = vld [vmem:[%s736_s0] sm:$0xff]  ;;  %v29_v7 = vld [vmem:[%s736_s0 + $0x88] sm:$0xff]  ;;  %v30_v9 = vld [vmem:[%s736_s0 + $0x90] sm:$0xff] }
   0x4   :  { %488 = vmatprep.subr.mxu0 %v46_v1  ;;  %543 = vmatprep.subr.mxu1 %v46_v1  ;;  %v28_v5 = vld [vmem:[%s736_s0 + $0x80] sm:$0xff]  ;;  %v15_v10 = vld [vmem:[%s736_s0 + $0x18] sm:$0xff] }
   0x5   :  { %489 = vmatpush3.msra.mxu0 %v46_v1  ;;  %547 = vmatpush3.msra.mxu1 %v46_v1  ;;  %v31_v11 = vld [vmem:[%s736_s0 + $0x98] sm:$0xff]  ;;  %v16_v12 = vld [vmem:[%s736_s0 + $0x20] sm:$0xff] }
   0x6   :  { %490 = vmatprep.subr.mxu0 %v45_v2  ;;  %544 = vmatprep.subr.mxu1 %v45_v2  ;;  %v32_v13 = vld [vmem:[%s736_s0 + $0xa0] sm:$0xff] }
   0x7   :  { %491 = vmatpush3.msra.mxu0 %v45_v2  ;;  %548 = vmatpush3.msra.mxu1 %v45_v2 }
   0x8   :  { %492 = vmatprep.subr.mxu0 %v44_v3  ;;  %545 = vmatprep.subr.mxu1 %v44_v3 }
   0x9   :  { %493 = vmatpush3.msra.mxu0 %v44_v3  ;;  %549 = vmatpush3.msra.mxu1 %v44_v3 }
   0xa   :  { %494 = vmatprep.mubr.msk.f32.mxu0 %vm48_vm0, %v12_v4  ;;  %518 = vmatprep.mubr.msk.f32.mxu1 %vm48_vm0, %v28_v5 }
   0xb   :  { %495 = vmatmul.mubr.msk.f32.vlgmr.msra.gmra.mxu0 %vm48_vm0, %v13_v6  ;;  %519 = vmatmul.mubr.msk.f32.vlgmr.msra.gmra.mxu1 %vm48_vm0, %v29_v7 }
   0xc   :  { %497 = vmatprep.mubr.msk.f32.mxu0 %vm48_vm0, %v14_v8  ;;  %521 = vmatprep.mubr.msk.f32.mxu1 %vm48_vm0, %v30_v9 }
   0xd   :  { %7 = vsyncpa [#allocation3], 0  ;;  %v17_v14 = vld [vmem:[%s736_s0 + $0x28] sm:$0xff]  ;;  %v18_v16 = vld [vmem:[%s736_s0 + $0x30] sm:$0xff] }
   0xe   :  { %v33_v15 = vld [vmem:[%s736_s0 + $0xa8] sm:$0xff]  ;;  %v34_v17 = vld [vmem:[%s736_s0 + $0xb0] sm:$0xff]  ;;  %v19_v18 = vld [vmem:[%s736_s0 + $0x38] sm:$0xff] }
   0xf   :  { %498 = vmatmul.mubr.msk.f32.gmra.mxu0 %vm48_vm0, %v15_v10  ;;  %522 = vmatmul.mubr.msk.f32.gmra.mxu1 %vm48_vm0, %v31_v11  ;;  %v35_v19 = vld [vmem:[%s736_s0 + $0xb8] sm:$0xff]  ;;  %v20_v20 = vld [vmem:[%s736_s0 + $0x40] sm:$0xff]  ;;  %v21_v22 = vld [vmem:[%s736_s0 + $0x48] sm:$0xff] }
  0x10   :  { %500 = vmatprep.mubr.msk.f32.mxu0 %vm48_vm0, %v16_v12  ;;  %524 = vmatprep.mubr.msk.f32.mxu1 %vm48_vm0, %v32_v13  ;;  %v36_v21 = vld [vmem:[%s736_s0 + $0xc0] sm:$0xff]  ;;  %v37_v23 = vld [vmem:[%s736_s0 + $0xc8] sm:$0xff]  ;;  %v22_v24 = vld [vmem:[%s736_s0 + $0x50] sm:$0xff] }
  0x11   :  { %v38_v25 = vld [vmem:[%s736_s0 + $0xd0] sm:$0xff]  ;;  %v23_v26 = vld [vmem:[%s736_s0 + $0x58] sm:$0xff]  ;;  %v24_v28 = vld [vmem:[%s736_s0 + $0x60] sm:$0xff] }
  0x12   :  { %v39_v27 = vld [vmem:[%s736_s0 + $0xd8] sm:$0xff]  ;;  %v40_v29 = vld [vmem:[%s736_s0 + $0xe0] sm:$0xff]  ;;  %v25_v30 = vld [vmem:[%s736_s0 + $0x68] sm:$0xff] }
  0x13   :  { %501 = vmatmul.mubr.msk.f32.gmra.mxu0 %vm48_vm0, %v17_v14  ;;  %525 = vmatmul.mubr.msk.f32.gmra.mxu1 %vm48_vm0, %v33_v15  ;;  %v41_v31 = vld [vmem:[%s736_s0 + $0xe8] sm:$0xff]  ;;  %v26_v32 = vld [vmem:[%s736_s0 + $0x70] sm:$0xff]  ;;  %v27_v34 = vld [vmem:[%s736_s0 + $0x78] sm:$0xff] }
  0x14   :  { %503 = vmatprep.mubr.msk.f32.mxu0 %vm48_vm0, %v18_v16  ;;  %527 = vmatprep.mubr.msk.f32.mxu1 %vm48_vm0, %v34_v17  ;;  %v42_v33 = vld [vmem:[%s736_s0 + $0xf0] sm:$0xff]  ;;  %v43_v35 = vld [vmem:[%s736_s0 + $0xf8] sm:$0xff]  ;;  %s575_s0 = smov [#allocation2]  }
  0x15   :  { %s407_s1 = sshll.u32 %s575_s0, 4  ;;  %s408_s1 = int_to_ptr.vmem [resolvable:$true] %s407_s1 }
  0x16   :  { %s553_s23 = scalar_lea.vmem %s408_s1, 4096  ;;  %p558_p1 = scmp.lt.s32.totalorder %s408_s1, %s408_s1 }
  0x17   :  { %504 = vmatmul.mubr.msk.f32.gmra.mxu0 %vm48_vm0, %v19_v18  ;;  %528 = vmatmul.mubr.msk.f32.gmra.mxu1 %vm48_vm0, %v35_v19  ;;  %p554_p0 = scmp.ne.s32.totalorder %s408_s1, %s553_s23  ;;  %p559_p2 = scmp.lt.s32.totalorder %s553_s23, %s553_s23 }
  0x18   :  { %506 = vmatprep.mubr.msk.f32.mxu0 %vm48_vm0, %v20_v20  ;;  %530 = vmatprep.mubr.msk.f32.mxu1 %vm48_vm0, %v36_v21 }
  0x19   :  { %p560_p3 = por %p559_p2, %p558_p1 }
  0x1b   :  { %507 = vmatmul.mubr.msk.f32.gmra.mxu0 %vm48_vm0, %v21_v22  ;;  %531 = vmatmul.mubr.msk.f32.gmra.mxu1 %vm48_vm0, %v37_v23  ;;  %p561_p4 = pnand %p560_p3, %p554_p0 }
  0x1c   :  { %509 = vmatprep.mubr.msk.f32.mxu0 %vm48_vm0, %v22_v24  ;;  %533 = vmatprep.mubr.msk.f32.mxu1 %vm48_vm0, %v38_v25 }
  0x1f   :  { %510 = vmatmul.mubr.msk.f32.gmra.mxu0 %vm48_vm0, %v23_v26  ;;  %534 = vmatmul.mubr.msk.f32.gmra.mxu1 %vm48_vm0, %v39_v27 }
  0x20   :  { %512 = vmatprep.mubr.msk.f32.mxu0 %vm48_vm0, %v24_v28  ;;  %536 = vmatprep.mubr.msk.f32.mxu1 %vm48_vm0, %v40_v29 }
  0x23   :  { %513 = vmatmul.mubr.msk.f32.gmra.mxu0 %vm48_vm0, %v25_v30  ;;  %537 = vmatmul.mubr.msk.f32.gmra.mxu1 %vm48_vm0, %v41_v31 }
  0x24   :  { %515 = vmatprep.mubr.msk.f32.mxu0 %vm48_vm0, %v26_v32  ;;  %539 = vmatprep.mubr.msk.f32.mxu1 %vm48_vm0, %v42_v33 }
  0x27   :  { %516 = vmatmul.mubr.msk.f32.gmra.mxu0 %vm48_vm0, %v27_v34  ;;  %540 = vmatmul.mubr.msk.f32.gmra.mxu1 %vm48_vm0, %v43_v35 }
  0xcb   :  { %v496_v36 = vpop.f32.mrf.mxu0  ;;  %v520_v37 = vpop.f32.mrf.mxu1 }
  0xcc   :  { %371 = vst [vmem:[#allocation2 + $0x8] sm:$0xff] %v496_v36  ;;  %387 = vst [vmem:[#allocation2 + $0x88] sm:$0xff] %v520_v37 }
  0xcd   :  { %v211_v38 = vpop.f32.mrf.mxu0  ;;  %v291_v39 = vpop.f32.mrf.mxu1 }
  0xce   :  { %370 = vst [vmem:[#allocation2] sm:$0xff] %v211_v38  ;;  %386 = vst [vmem:[#allocation2 + $0x80] sm:$0xff] %v291_v39 }
  0xcf   :  { %v499_v40 = vpop.f32.mrf.mxu0  ;;  %v523_v41 = vpop.f32.mrf.mxu1 }
  0xd0   :  { %373 = vst [vmem:[#allocation2 + $0x18] sm:$0xff] %v499_v40  ;;  %389 = vst [vmem:[#allocation2 + $0x98] sm:$0xff] %v523_v41 }
  0xd1   :  { %v221_v42 = vpop.f32.mrf.mxu0  ;;  %v301_v43 = vpop.f32.mrf.mxu1 }
  0xd2   :  { %372 = vst [vmem:[#allocation2 + $0x10] sm:$0xff] %v221_v42  ;;  %388 = vst [vmem:[#allocation2 + $0x90] sm:$0xff] %v301_v43 }
  0xd3   :  { %v502_v44 = vpop.f32.mrf.mxu0  ;;  %v526_v45 = vpop.f32.mrf.mxu1 }
  0xd4   :  { %375 = vst [vmem:[#allocation2 + $0x28] sm:$0xff] %v502_v44  ;;  %391 = vst [vmem:[#allocation2 + $0xa8] sm:$0xff] %v526_v45 }
  0xd5   :  { %v231_v46 = vpop.f32.mrf.mxu0  ;;  %v311_v47 = vpop.f32.mrf.mxu1 }
  0xd6   :  { %374 = vst [vmem:[#allocation2 + $0x20] sm:$0xff] %v231_v46  ;;  %390 = vst [vmem:[#allocation2 + $0xa0] sm:$0xff] %v311_v47 }
  0xd7   :  { %v505_v48 = vpop.f32.mrf.mxu0  ;;  %v529_v49 = vpop.f32.mrf.mxu1 }
  0xd8   :  { %377 = vst [vmem:[#allocation2 + $0x38] sm:$0xff] %v505_v48  ;;  %393 = vst [vmem:[#allocation2 + $0xb8] sm:$0xff] %v529_v49 }
  0xd9   :  { %v241_v50 = vpop.f32.mrf.mxu0  ;;  %v321_v51 = vpop.f32.mrf.mxu1 }
  0xda   :  { %376 = vst [vmem:[#allocation2 + $0x30] sm:$0xff] %v241_v50  ;;  %392 = vst [vmem:[#allocation2 + $0xb0] sm:$0xff] %v321_v51 }
  0xdb   :  { %v508_v52 = vpop.f32.mrf.mxu0  ;;  %v532_v53 = vpop.f32.mrf.mxu1 }
  0xdc   :  { %379 = vst [vmem:[#allocation2 + $0x48] sm:$0xff] %v508_v52  ;;  %395 = vst [vmem:[#allocation2 + $0xc8] sm:$0xff] %v532_v53 }
  0xdd   :  { %v251_v54 = vpop.f32.mrf.mxu0  ;;  %v331_v55 = vpop.f32.mrf.mxu1 }
  0xde   :  { %378 = vst [vmem:[#allocation2 + $0x40] sm:$0xff] %v251_v54  ;;  %394 = vst [vmem:[#allocation2 + $0xc0] sm:$0xff] %v331_v55 }
  0xdf   :  { %v511_v56 = vpop.f32.mrf.mxu0  ;;  %v535_v57 = vpop.f32.mrf.mxu1 }
  0xe0   :  { %381 = vst [vmem:[#allocation2 + $0x58] sm:$0xff] %v511_v56  ;;  %397 = vst [vmem:[#allocation2 + $0xd8] sm:$0xff] %v535_v57 }
  0xe1   :  { %v261_v58 = vpop.f32.mrf.mxu0  ;;  %v341_v59 = vpop.f32.mrf.mxu1 }
  0xe2   :  { %380 = vst [vmem:[#allocation2 + $0x50] sm:$0xff] %v261_v58  ;;  %396 = vst [vmem:[#allocation2 + $0xd0] sm:$0xff] %v341_v59 }
  0xe3   :  { %v514_v60 = vpop.f32.mrf.mxu0  ;;  %v538_v61 = vpop.f32.mrf.mxu1 }
  0xe4   :  { %383 = vst [vmem:[#allocation2 + $0x68] sm:$0xff] %v514_v60  ;;  %399 = vst [vmem:[#allocation2 + $0xe8] sm:$0xff] %v538_v61 }
  0xe5   :  { %v271_v62 = vpop.f32.mrf.mxu0  ;;  %v351_v63 = vpop.f32.mrf.mxu1 }
  0xe6   :  { %382 = vst [vmem:[#allocation2 + $0x60] sm:$0xff] %v271_v62  ;;  %398 = vst [vmem:[#allocation2 + $0xe0] sm:$0xff] %v351_v63 }
  0xe7   :  { %v517_v0 = vpop.f32.mrf.mxu0  ;;  %v541_v1 = vpop.f32.mrf.mxu1 }
  0xe8   :  { %385 = vst [vmem:[#allocation2 + $0x78] sm:$0xff] %v517_v0  ;;  %401 = vst [vmem:[#allocation2 + $0xf8] sm:$0xff] %v541_v1 }
  0xe9   :  { %v281_v2 = vpop.f32.mrf.mxu0  ;;  %v361_v3 = vpop.f32.mrf.mxu1 }
  0xea   :  { %384 = vst [vmem:[#allocation2 + $0x70] sm:$0xff] %v281_v2  ;;  %400 = vst [vmem:[#allocation2 + $0xf0] sm:$0xff] %v361_v3 }
  0xeb   :  { %564 = shalt.err (!%p561_p4)
}
  0xec   :  { %s576_s24 = smov 128   ;;  %s577_s25 = smov 8  }
  0xed   :  { %413 = dma.vmem_to_hbm [thread:$0]  %s408_s1, 4096, %s738_s2, [#allocation3], %s576_s24, %s576_s24, %s577_s25  }
  0xee   :  { %573 = dma.done.wait [#allocation3], 4096  }
  0xef   :  { %574 = vsyncadd [#allocation3], 4294963200 }
  0xf0   :  { %417 = vsyncpa [#allocation3], 1 }

</bundles_post_ra>
